<compile_context>
chip_gen: v7x
topology: tpu7x:2x2x1
jax: 0.10.0
libtpu: 0.0.40
codegen_flags: <defaults>
</compile_context>

<pallas_src>
import math
import jax
import jax.numpy as jnp
from jax.experimental import pallas as pl
from jax.experimental.pallas import tpu as pltpu


# ----------------------------- Pallas kernel --------------------------------

def pointconv_kernel(x_ref, xj_ref, d_ref,
                     wx_ref, bh1_ref, wf1a_ref, wh2f_ref, wf1b_ref, bf1_ref,
                     wf2g_ref, bg1_ref, wg2_ref, bg2_ref,
                     out_ref):
    f32 = jnp.float32
    bf16 = jnp.bfloat16
    E = out_ref.shape[1]

    x = x_ref[...]                      # (tm, E) bf16
    xj = xj_ref[...]                    # (tm, E) bf16
    d = d_ref[...]                      # (tm, C) f32

    # --- x @ [Wh1 | Wg1x]: one wide MXU push, split in-register -------------
    xw = jnp.dot(x, wx_ref[...], preferred_element_type=f32)      # (tm, 2E)
    h1 = jnp.maximum(xw[:, :E] + bh1_ref[...], 0.0)               # h: Linear + ReLU
    g1x = xw[:, E:]                                               # x-part of g's 1st Linear

    # --- f pre-activation ----------------------------------------------------
    #   (d + delta) @ Wf1a + x_j @ Wf1b + bf1
    # = d @ Wf1a              (K = C = 3 -> VPU broadcast FMAs; MXU would waste ~97%)
    # + h1 @ (Wh2 @ Wf1a)     (fused offline; replaces two badly shaped matmuls)
    # + x_j @ Wf1b + (bf1 + bh2 @ Wf1a)
    wf1a = wf1a_ref[...]                                          # (C, E) f32
    dterm = d[:, 0:1] * wf1a[0:1, :]
    for c in range(1, d.shape[1]):
        dterm = dterm + d[:, c:c + 1] * wf1a[c:c + 1, :]

    f1 = jnp.maximum(
        dterm
        + jnp.dot(h1.astype(bf16), wh2f_ref[...], preferred_element_type=f32)
        + jnp.dot(xj, wf1b_ref[...], preferred_element_type=f32)
        + bf1_ref[...], 0.0)

    # max-aggregation over the single (k=1) incoming edge is the identity, and the
    # message's second linear (Wf2) is fused into g's first linear (Wg1m) offline:
    #   m @ Wg1m = f1 @ (Wf2 @ Wg1m) + bf2 @ Wg1m
    g1 = jnp.maximum(
        g1x
        + jnp.dot(f1.astype(bf16), wf2g_ref[...], preferred_element_type=f32)
        + bg1_ref[...], 0.0)

    out = jnp.dot(g1.astype(bf16), wg2_ref[...], preferred_element_type=f32) + bg2_ref[...]

    # residual (f32)
    out_ref[...] = (x.astype(f32) + out).astype(out_ref.dtype)


FUSED_ORDER = ("wx", "bh1", "wf1a", "wh2f", "wf1b", "bf1p", "wf2g", "bg1p", "wg2", "bg2")


def fuse_params(params):
    """Fold PointConv weights into the reduced set the kernel consumes.

    Exact algebraic rewrites (fp rounding differs only in the last bits):
      wh2f = Wh2 @ Wf1a            bf1p = bf1 + bh2 @ Wf1a
      wf2g = Wf2 @ Wg1m            bg1p = bg1 + bf2 @ Wg1m
      wx   = [Wh1 | Wg1x]
    """
    f32, bf16 = jnp.float32, jnp.bfloat16
    wh2f = params["wh2"] @ params["wf1a"]
    bf1p = params["bf1"] + params["bh2"] @ params["wf1a"]
    wf2g = params["wf2"] @ params["wg1m"]
    bg1p = params["bg1"] + params["bf2"] @ params["wg1m"]
    wx = jnp.concatenate([params["wh1"], params["wg1x"]], axis=1)
    return dict(
        wx=wx.astype(bf16),
        bh1=params["bh1"].astype(f32),
        wf1a=params["wf1a"].astype(f32),     # consumed on the VPU (K = 3)
        wh2f=wh2f.astype(bf16),
        wf1b=params["wf1b"].astype(bf16),
        bf1p=bf1p.astype(f32),
        wf2g=wf2g.astype(bf16),
        bg1p=bg1p.astype(f32),
        wg2=params["wg2"].astype(bf16),
        bg2=params["bg2"].astype(f32),
    )


def _choose_tm(n):
    # Large tiles amortize the ~0.35 us per-grid-step overhead; keep >= 2 grid
    # steps so v7x's two TensorCores both get work ("parallel" grid axis).
    target = max(8, min(512, (n + 1) // 2))
    return ((target + 7) // 8) * 8          # multiple of 8 sublanes


def pointconv_pallas(x, x_j, dist, params, tm=None):
    N, E = x.shape
    C = dist.shape[1]
    out_dtype = x.dtype

    if tm is None:
        tm = _choose_tm(N)
    n_pad = (-N) % tm
    if n_pad:
        x = jnp.pad(x, ((0, n_pad), (0, 0)))
        x_j = jnp.pad(x_j, ((0, n_pad), (0, 0)))
        dist = jnp.pad(dist, ((0, n_pad), (0, 0)))
    Np = N + n_pad

    # bf16 activations: native full-rate MXU path + half the HBM->VMEM bytes;
    # accumulation stays f32 via preferred_element_type.
    x_bf = x.astype(jnp.bfloat16)
    xj_bf = x_j.astype(jnp.bfloat16)
    dist = dist.astype(jnp.float32)

    fused = fuse_params(params)
    weights = [fused[k] for k in FUSED_ORDER]

    def row_spec(dd):
        return pl.BlockSpec((tm, dd), lambda i: (i, 0))

    def full_spec(shape):
        return pl.BlockSpec(shape, lambda i: (0,) * len(shape))

    in_specs = [row_spec(E), row_spec(E), row_spec(C)] + \
               [full_spec(w.shape) for w in weights]

    out = pl.pallas_call(
        pointconv_kernel,
        out_shape=jax.ShapeDtypeStruct((Np, E), out_dtype),
        grid=(Np // tm,),
        in_specs=in_specs,
        out_specs=row_spec(E),
        compiler_params=pltpu.CompilerParams(dimension_semantics=("parallel",)),
    )(x_bf, xj_bf, dist, *weights)

    # TODO(synk): E=32 output columns -> masked (32/128-lane) stores; a lane-dense
    # [N/4, 128] packed output would help at scale but requires an in-kernel
    # sublane->lane reshape that Mosaic may reject, so it is left out for robustness.
    return out[:N] if n_pad else out


# ------------------------------ JAX glue -------------------------------------

def fps(pos, ratio):
    """Deterministic farthest-point sampling (start at point 0)."""
    # TODO(synk): serial O(m*N) loop; dominant at large N — fine for the toy size here.
    N = pos.shape[0]
    m = int(math.ceil(ratio * N))

    def body(i, state):
        idx, dists = state
        last = idx[i - 1]
        d = jnp.sum((pos - pos[last]) ** 2, axis=-1)
        dists = jnp.minimum(dists, d)
        nxt = jnp.argmax(dists).astype(jnp.int32)
        return idx.at[i].set(nxt), dists

    idx0 = jnp.zeros((m,), jnp.int32)
    dists0 = jnp.full((N,), jnp.inf, jnp.float32)
    idx, _ = jax.lax.fori_loop(1, m, body, (idx0, dists0))
    return idx


def knn1(pos_sampled, pos):
    """k=1: for each point in `pos`, nearest point in `pos_sampled`."""
    d2 = jnp.sum((pos[:, None, :] - pos_sampled[None, :, :]) ** 2, axis=-1)
    nn = jnp.argmin(d2, axis=1).astype(jnp.int32)
    row = jnp.arange(pos.shape[0], dtype=jnp.int32)
    return jnp.stack([row, nn], axis=0)          # [2, N]


def sa_module_forward(params, x, pos, edge_index, ratio=0.5, k=1):
    del edge_index  # stored-only in the reference forward; not used in the conv.
    assert k == 1, "k=1 (module default); k>1 would need a segment-max aggregation"
    idx = fps(pos, ratio)                        # [N']
    pos_sampled = pos[idx]                       # [N', C]
    assign_index = knn1(pos_sampled, pos)        # [2, N]

    # TODO(synk): at scale, move this gather inside the kernel via scalar-prefetched
    # indices to avoid an extra HBM pass over x; negligible at N=64.
    nbr = idx[assign_index[1]]                   # full-set index of nearest sampled pt
    x_j = x[nbr]                                 # [N, E]
    dist = pos[nbr] - pos                        # [N, C] relative position (per-edge)

    x_out = pointconv_pallas(x, x_j, dist, params)
    return x_out, pos_sampled, assign_index


# --------------------------- parameter init ----------------------------------

def init_params(key, E, C):
    def linear(key, fan_in, fan_out):
        kw, kb = jax.random.split(key)
        bound = 1.0 / math.sqrt(fan_in)
        w = jax.random.uniform(kw, (fan_in, fan_out), jnp.float32, -bound, bound)
        b = jax.random.uniform(kb, (1, fan_out), jnp.float32, -bound, bound)
        return w, b

    ks = jax.random.split(key, 6)
    wh1, bh1 = linear(ks[0], E, E)
    wh2, bh2 = linear(ks[1], E, C)
    wf1, bf1 = linear(ks[2], C + E, E)           # split rows: [dist+delta | x_j]
    wf2, bf2 = linear(ks[3], E, E)
    wg1, bg1 = linear(ks[4], 2 * E, E)           # split rows: [x | aggregated msg]
    wg2, bg2 = linear(ks[5], E, E)
    return dict(
        wh1=wh1, bh1=bh1, wh2=wh2, bh2=bh2,
        wf1a=wf1[:C], wf1b=wf1[C:], bf1=bf1, wf2=wf2, bf2=bf2,
        wg1x=wg1[:E], wg1m=wg1[E:], bg1=bg1, wg2=wg2, bg2=bg2,
    )


# ------------------------------- main -----------------------------------------

if __name__ == "__main__":
    N, E, C = 64, 32, 3          # nodes, embed_size, config_size (=pos dim)
    ratio, k = 0.5, 1

    key = jax.random.PRNGKey(0)
    kx, kpos, kedge, kparam = jax.random.split(key, 4)
    x = jax.random.normal(kx, (N, E), jnp.float32)
    pos = jax.random.normal(kpos, (N, C), jnp.float32)
    edge_index = jax.random.randint(kedge, (2, 128), 0, N, jnp.int32)

    params = init_params(kparam, E, C)

    x_out, pos_out, assign_index = sa_module_forward(params, x, pos, edge_index,
                                                     ratio=ratio, k=k)
    jax.block_until_ready((x_out, pos_out, assign_index))

    assert x_out.shape == (N, E)
    assert pos_out.shape == (int(math.ceil(ratio * N)), C)
    assert assign_index.shape == (2, N)
    assert bool(jnp.all(jnp.isfinite(x_out)))
    print("KERNEL_OK")
</pallas_src>

<mosaic_0001>
module attributes {stable_mosaic.version = 11 : i64} {
  func.func @pointconv_kernel(%arg0: i32, %arg1: memref<32x32xbf16, #tpu.memory_space<vmem>>, %arg2: memref<32x32xbf16, #tpu.memory_space<vmem>>, %arg3: memref<32x3xf32, #tpu.memory_space<vmem>>, %arg4: memref<32x64xbf16, #tpu.memory_space<vmem>>, %arg5: memref<1x32xf32, #tpu.memory_space<vmem>>, %arg6: memref<3x32xf32, #tpu.memory_space<vmem>>, %arg7: memref<32x32xbf16, #tpu.memory_space<vmem>>, %arg8: memref<32x32xbf16, #tpu.memory_space<vmem>>, %arg9: memref<1x32xf32, #tpu.memory_space<vmem>>, %arg10: memref<32x32xbf16, #tpu.memory_space<vmem>>, %arg11: memref<1x32xf32, #tpu.memory_space<vmem>>, %arg12: memref<32x32xbf16, #tpu.memory_space<vmem>>, %arg13: memref<1x32xf32, #tpu.memory_space<vmem>>, %arg14: memref<32x32xf32, #tpu.memory_space<vmem>>) attributes {dimension_semantics = [#tpu.dimension_semantics<parallel>], iteration_bounds = array<i64: 2>, scalar_prefetch = 0 : i64, scratch_operands = 0 : i64, tpu.core_type = #tpu.core_type<tc>, window_params = [{transform_indices = @transform_0, window_bounds = array<i64: 32, 32>}, {transform_indices = @transform_1, window_bounds = array<i64: 32, 32>}, {transform_indices = @transform_2, window_bounds = array<i64: 32, 3>}, {pipeline_mode = #tpu.pipeline_mode<synchronous>, transform_indices = @transform_3, window_bounds = array<i64: 32, 64>}, {pipeline_mode = #tpu.pipeline_mode<synchronous>, transform_indices = @transform_4, window_bounds = array<i64: 1, 32>}, {pipeline_mode = #tpu.pipeline_mode<synchronous>, transform_indices = @transform_5, window_bounds = array<i64: 3, 32>}, {pipeline_mode = #tpu.pipeline_mode<synchronous>, transform_indices = @transform_6, window_bounds = array<i64: 32, 32>}, {pipeline_mode = #tpu.pipeline_mode<synchronous>, transform_indices = @transform_7, window_bounds = array<i64: 32, 32>}, {pipeline_mode = #tpu.pipeline_mode<synchronous>, transform_indices = @transform_8, window_bounds = array<i64: 1, 32>}, {pipeline_mode = #tpu.pipeline_mode<synchronous>, transform_indices = @transform_9, window_bounds = array<i64: 32, 32>}, {pipeline_mode = #tpu.pipeline_mode<synchronous>, transform_indices = @transform_10, window_bounds = array<i64: 1, 32>}, {pipeline_mode = #tpu.pipeline_mode<synchronous>, transform_indices = @transform_11, window_bounds = array<i64: 32, 32>}, {pipeline_mode = #tpu.pipeline_mode<synchronous>, transform_indices = @transform_12, window_bounds = array<i64: 1, 32>}, {transform_indices = @transform_13, window_bounds = array<i64: 32, 32>}]} {
    %c0 = arith.constant 0 : index
    %c0_0 = arith.constant 0 : index
    %0 = vector.load %arg1[%c0, %c0_0] : memref<32x32xbf16, #tpu.memory_space<vmem>>, vector<32x32xbf16>
    %c0_1 = arith.constant 0 : index
    %c0_2 = arith.constant 0 : index
    %1 = vector.load %arg2[%c0_1, %c0_2] : memref<32x32xbf16, #tpu.memory_space<vmem>>, vector<32x32xbf16>
    %c0_3 = arith.constant 0 : index
    %c0_4 = arith.constant 0 : index
    %2 = vector.load %arg3[%c0_3, %c0_4] : memref<32x3xf32, #tpu.memory_space<vmem>>, vector<32x3xf32>
    %c0_5 = arith.constant 0 : index
    %c0_6 = arith.constant 0 : index
    %3 = vector.load %arg4[%c0_5, %c0_6] : memref<32x64xbf16, #tpu.memory_space<vmem>>, vector<32x64xbf16>
    %cst = arith.constant dense<0.000000e+00> : vector<32x64xf32>
    %4 = tpu.matmul %0, %3, %cst {dimension_numbers = #tpu.dot_dimension_numbers<[1], [0], [0], [1], [0, 0, 1, 1], [], []>} : vector<32x32xbf16>, vector<32x64xbf16>, vector<32x64xf32> -> vector<32x64xf32>
    %5 = vector.extract_strided_slice %4 {offsets = [0, 0], sizes = [32, 32], strides = [1, 1]} : vector<32x64xf32> to vector<32x32xf32>
    %c0_7 = arith.constant 0 : index
    %c0_8 = arith.constant 0 : index
    %6 = vector.load %arg5[%c0_7, %c0_8] : memref<1x32xf32, #tpu.memory_space<vmem>>, vector<1x32xf32>
    %7 = vector.broadcast %6 : vector<1x32xf32> to vector<32x32xf32>
    %8 = arith.addf %5, %7 : vector<32x32xf32>
    %cst_9 = arith.constant 0.000000e+00 : f32
    %9 = vector.broadcast %cst_9 : f32 to vector<32x32xf32>
    %10 = arith.maximumf %8, %9 : vector<32x32xf32>
    %11 = vector.extract_strided_slice %4 {offsets = [0, 32], sizes = [32, 32], strides = [1, 1]} : vector<32x64xf32> to vector<32x32xf32>
    %c0_10 = arith.constant 0 : index
    %c0_11 = arith.constant 0 : index
    %12 = vector.load %arg6[%c0_10, %c0_11] : memref<3x32xf32, #tpu.memory_space<vmem>>, vector<3x32xf32>
    %13 = vector.extract_strided_slice %2 {offsets = [0, 0], sizes = [32, 1], strides = [1, 1]} : vector<32x3xf32> to vector<32x1xf32>
    %14 = vector.extract_strided_slice %12 {offsets = [0, 0], sizes = [1, 32], strides = [1, 1]} : vector<3x32xf32> to vector<1x32xf32>
    %15 = vector.broadcast %13 : vector<32x1xf32> to vector<32x32xf32>
    %16 = vector.broadcast %14 : vector<1x32xf32> to vector<32x32xf32>
    %17 = arith.mulf %15, %16 : vector<32x32xf32>
    %18 = vector.extract_strided_slice %2 {offsets = [0, 1], sizes = [32, 1], strides = [1, 1]} : vector<32x3xf32> to vector<32x1xf32>
    %19 = vector.extract_strided_slice %12 {offsets = [1, 0], sizes = [1, 32], strides = [1, 1]} : vector<3x32xf32> to vector<1x32xf32>
    %20 = vector.broadcast %18 : vector<32x1xf32> to vector<32x32xf32>
    %21 = vector.broadcast %19 : vector<1x32xf32> to vector<32x32xf32>
    %22 = arith.mulf %20, %21 : vector<32x32xf32>
    %23 = arith.addf %17, %22 : vector<32x32xf32>
    %24 = vector.extract_strided_slice %2 {offsets = [0, 2], sizes = [32, 1], strides = [1, 1]} : vector<32x3xf32> to vector<32x1xf32>
    %25 = vector.extract_strided_slice %12 {offsets = [2, 0], sizes = [1, 32], strides = [1, 1]} : vector<3x32xf32> to vector<1x32xf32>
    %26 = vector.broadcast %24 : vector<32x1xf32> to vector<32x32xf32>
    %27 = vector.broadcast %25 : vector<1x32xf32> to vector<32x32xf32>
    %28 = arith.mulf %26, %27 : vector<32x32xf32>
    %29 = arith.addf %23, %28 : vector<32x32xf32>
    %30 = arith.truncf %10 : vector<32x32xf32> to vector<32x32xbf16>
    %c0_12 = arith.constant 0 : index
    %c0_13 = arith.constant 0 : index
    %31 = vector.load %arg7[%c0_12, %c0_13] : memref<32x32xbf16, #tpu.memory_space<vmem>>, vector<32x32xbf16>
    %cst_14 = arith.constant dense<0.000000e+00> : vector<32x32xf32>
    %32 = tpu.matmul %30, %31, %cst_14 {dimension_numbers = #tpu.dot_dimension_numbers<[1], [0], [0], [1], [0, 0, 1, 1], [], []>} : vector<32x32xbf16>, vector<32x32xbf16>, vector<32x32xf32> -> vector<32x32xf32>
    %33 = arith.addf %29, %32 : vector<32x32xf32>
    %c0_15 = arith.constant 0 : index
    %c0_16 = arith.constant 0 : index
    %34 = vector.load %arg8[%c0_15, %c0_16] : memref<32x32xbf16, #tpu.memory_space<vmem>>, vector<32x32xbf16>
    %cst_17 = arith.constant dense<0.000000e+00> : vector<32x32xf32>
    %35 = tpu.matmul %1, %34, %cst_17 {dimension_numbers = #tpu.dot_dimension_numbers<[1], [0], [0], [1], [0, 0, 1, 1], [], []>} : vector<32x32xbf16>, vector<32x32xbf16>, vector<32x32xf32> -> vector<32x32xf32>
    %36 = arith.addf %33, %35 : vector<32x32xf32>
    %c0_18 = arith.constant 0 : index
    %c0_19 = arith.constant 0 : index
    %37 = vector.load %arg9[%c0_18, %c0_19] : memref<1x32xf32, #tpu.memory_space<vmem>>, vector<1x32xf32>
    %38 = vector.broadcast %37 : vector<1x32xf32> to vector<32x32xf32>
    %39 = arith.addf %36, %38 : vector<32x32xf32>
    %cst_20 = arith.constant 0.000000e+00 : f32
    %40 = vector.broadcast %cst_20 : f32 to vector<32x32xf32>
    %41 = arith.maximumf %39, %40 : vector<32x32xf32>
    %42 = arith.truncf %41 : vector<32x32xf32> to vector<32x32xbf16>
    %c0_21 = arith.constant 0 : index
    %c0_22 = arith.constant 0 : index
    %43 = vector.load %arg10[%c0_21, %c0_22] : memref<32x32xbf16, #tpu.memory_space<vmem>>, vector<32x32xbf16>
    %cst_23 = arith.constant dense<0.000000e+00> : vector<32x32xf32>
    %44 = tpu.matmul %42, %43, %cst_23 {dimension_numbers = #tpu.dot_dimension_numbers<[1], [0], [0], [1], [0, 0, 1, 1], [], []>} : vector<32x32xbf16>, vector<32x32xbf16>, vector<32x32xf32> -> vector<32x32xf32>
    %45 = arith.addf %11, %44 : vector<32x32xf32>
    %c0_24 = arith.constant 0 : index
    %c0_25 = arith.constant 0 : index
    %46 = vector.load %arg11[%c0_24, %c0_25] : memref<1x32xf32, #tpu.memory_space<vmem>>, vector<1x32xf32>
    %47 = vector.broadcast %46 : vector<1x32xf32> to vector<32x32xf32>
    %48 = arith.addf %45, %47 : vector<32x32xf32>
    %cst_26 = arith.constant 0.000000e+00 : f32
    %49 = vector.broadcast %cst_26 : f32 to vector<32x32xf32>
    %50 = arith.maximumf %48, %49 : vector<32x32xf32>
    %51 = arith.truncf %50 : vector<32x32xf32> to vector<32x32xbf16>
    %c0_27 = arith.constant 0 : index
    %c0_28 = arith.constant 0 : index
    %52 = vector.load %arg12[%c0_27, %c0_28] : memref<32x32xbf16, #tpu.memory_space<vmem>>, vector<32x32xbf16>
    %cst_29 = arith.constant dense<0.000000e+00> : vector<32x32xf32>
    %53 = tpu.matmul %51, %52, %cst_29 {dimension_numbers = #tpu.dot_dimension_numbers<[1], [0], [0], [1], [0, 0, 1, 1], [], []>} : vector<32x32xbf16>, vector<32x32xbf16>, vector<32x32xf32> -> vector<32x32xf32>
    %c0_30 = arith.constant 0 : index
    %c0_31 = arith.constant 0 : index
    %54 = vector.load %arg13[%c0_30, %c0_31] : memref<1x32xf32, #tpu.memory_space<vmem>>, vector<1x32xf32>
    %55 = vector.broadcast %54 : vector<1x32xf32> to vector<32x32xf32>
    %56 = arith.addf %53, %55 : vector<32x32xf32>
    %57 = arith.extf %0 : vector<32x32xbf16> to vector<32x32xf32>
    %58 = arith.addf %57, %56 : vector<32x32xf32>
    %c0_32 = arith.constant 0 : index
    %c0_33 = arith.constant 0 : index
    %59 = vector.load %arg14[%c0_32, %c0_33] : memref<32x32xf32, #tpu.memory_space<vmem>>, vector<32x32xf32>
    tpu.vector_store %arg14[%c0_32, %c0_33], %58 {strides = array<i32>} : memref<32x32xf32, #tpu.memory_space<vmem>>, vector<32x32xf32>,
    return
  }
  func.func @transform_0(%arg0: i32) -> (i32, i32) {
    %c0_i32 = arith.constant 0 : i32
    %c0_i32_0 = arith.constant 0 : i32
    return %arg0, %c0_i32 : i32, i32
  }
  func.func @transform_1(%arg0: i32) -> (i32, i32) {
    %c0_i32 = arith.constant 0 : i32
    %c0_i32_0 = arith.constant 0 : i32
    return %arg0, %c0_i32 : i32, i32
  }
  func.func @transform_2(%arg0: i32) -> (i32, i32) {
    %c0_i32 = arith.constant 0 : i32
    %c0_i32_0 = arith.constant 0 : i32
    return %arg0, %c0_i32 : i32, i32
  }
  func.func @transform_3(%arg0: i32) -> (i32, i32) {
    %c0_i32 = arith.constant 0 : i32
    %c0_i32_0 = arith.constant 0 : i32
    %c0_i32_1 = arith.constant 0 : i32
    return %c0_i32, %c0_i32_0 : i32, i32
  }
  func.func @transform_4(%arg0: i32) -> (i32, i32) {
    %c0_i32 = arith.constant 0 : i32
    %c0_i32_0 = arith.constant 0 : i32
    %c0_i32_1 = arith.constant 0 : i32
    return %c0_i32, %c0_i32_0 : i32, i32
  }
  func.func @transform_5(%arg0: i32) -> (i32, i32) {
    %c0_i32 = arith.constant 0 : i32
    %c0_i32_0 = arith.constant 0 : i32
    %c0_i32_1 = arith.constant 0 : i32
    return %c0_i32, %c0_i32_0 : i32, i32
  }
  func.func @transform_6(%arg0: i32) -> (i32, i32) {
    %c0_i32 = arith.constant 0 : i32
    %c0_i32_0 = arith.constant 0 : i32
    %c0_i32_1 = arith.constant 0 : i32
    return %c0_i32, %c0_i32_0 : i32, i32
  }
  func.func @transform_7(%arg0: i32) -> (i32, i32) {
    %c0_i32 = arith.constant 0 : i32
    %c0_i32_0 = arith.constant 0 : i32
    %c0_i32_1 = arith.constant 0 : i32
    return %c0_i32, %c0_i32_0 : i32, i32
  }
  func.func @transform_8(%arg0: i32) -> (i32, i32) {
    %c0_i32 = arith.constant 0 : i32
    %c0_i32_0 = arith.constant 0 : i32
    %c0_i32_1 = arith.constant 0 : i32
    return %c0_i32, %c0_i32_0 : i32, i32
  }
  func.func @transform_9(%arg0: i32) -> (i32, i32) {
    %c0_i32 = arith.constant 0 : i32
    %c0_i32_0 = arith.constant 0 : i32
    %c0_i32_1 = arith.constant 0 : i32
    return %c0_i32, %c0_i32_0 : i32, i32
  }
  func.func @transform_10(%arg0: i32) -> (i32, i32) {
    %c0_i32 = arith.constant 0 : i32
    %c0_i32_0 = arith.constant 0 : i32
    %c0_i32_1 = arith.constant 0 : i32
    return %c0_i32, %c0_i32_0 : i32, i32
  }
  func.func @transform_11(%arg0: i32) -> (i32, i32) {
    %c0_i32 = arith.constant 0 : i32
    %c0_i32_0 = arith.constant 0 : i32
    %c0_i32_1 = arith.constant 0 : i32
    return %c0_i32, %c0_i32_0 : i32, i32
  }
  func.func @transform_12(%arg0: i32) -> (i32, i32) {
    %c0_i32 = arith.constant 0 : i32
    %c0_i32_0 = arith.constant 0 : i32
    %c0_i32_1 = arith.constant 0 : i32
    return %c0_i32, %c0_i32_0 : i32, i32
  }
  func.func @transform_13(%arg0: i32) -> (i32, i32) {
    %c0_i32 = arith.constant 0 : i32
    %c0_i32_0 = arith.constant 0 : i32
    return %arg0, %c0_i32 : i32, i32
  }
}

</mosaic_0001>

<bundles_post_ra>
// kernel: tpu_custom_call.1
= control target key start
LH: loop header
LB: loop body
LE: loop exit
PB: predicated region body
PF: predicated region fallthrough
CT: control target
= control target key end

     0   :  { %s1378_s25 = smov 0   ;;  %s1498_s0 = inlined_call_operand.vmem [shape: bf16[64,32], index: 0, kind: input, shape index: {}]   ;;  %s1499_s1 = inlined_call_operand.vmem [shape: bf16[64,32], index: 1, kind: input, shape index: {}]   ;;  %s1500_s2 = inlined_call_operand.vmem [shape: f32[64,3], index: 2, kind: input, shape index: {}]   ;;  %s1501_s3 = inlined_call_operand.vmem [shape: bf16[32,64], index: 3, kind: input, shape index: {}]   ;;  %s1502_s4 = inlined_call_operand.vmem [shape: f32[1,32], index: 4, kind: input, shape index: {}]   ;;  %s1503_s5 = inlined_call_operand.vmem [shape: f32[3,32], index: 5, kind: input, shape index: {}]   ;;  %s1504_s6 = inlined_call_operand.vmem [shape: bf16[32,32], index: 6, kind: input, shape index: {}]   ;;  %s1505_s7 = inlined_call_operand.vmem [shape: bf16[32,32], index: 7, kind: input, shape index: {}]   ;;  %s1506_s8 = inlined_call_operand.vmem [shape: f32[1,32], index: 8, kind: input, shape index: {}]   ;;  %s1507_s9 = inlined_call_operand.vmem [shape: bf16[32,32], index: 9, kind: input, shape index: {}]   ;;  %s1508_s10 = inlined_call_operand.vmem [shape: f32[1,32], index: 10, kind: input, shape index: {}]   ;;  %s1509_s11 = inlined_call_operand.vmem [shape: bf16[32,32], index: 11, kind: input, shape index: {}]   ;;  %s1510_s12 = inlined_call_operand.vmem [shape: f32[1,32], index: 12, kind: input, shape index: {}]   ;;  %s1511_s13 = inlined_call_operand.vmem [shape: f32[64,32], index: 13, kind: output, shape index: {}]  }
   0x1 LB: > { %s1148_s26 = sadd.s32 4294967295, %s1301_s25   ;;  %p1152_p0 = scmp.ge.s32.totalorder %s1301_s25, 1  ;;  %s1301_s25 = sphi %s1378_s25, %s23_s25  }
   0x2   : > { %p410_p1 = scmp.lt.s32.totalorder %s1301_s25, 3 }
   0x4   : > { %p411_p2 = pnand %p1152_p0, %p410_p1 }
   0x5   : > { %v1279_v0 = vld [vmem:[%s1501_s3] sm:$0xff] (!%p411_p2)   ;;  %s1153_s29 = sshll.u32 (!%p411_p2), %s1148_s26, 2  ;;  %v1280_v1 = vld [vmem:[%s1501_s3 + $0x8] sm:$0xff] (!%p411_p2)   ;;  %vm527_vm0 = vcmask (!%p411_p2), 261120   ;;  %v1303_v7 = vmov (!%p411_p2), 1   ;;  %v1304_v8 = vmov (!%p411_p2), 0   ;;  %v619_v38 = vlaneseq (!%p411_p2) }
   0x6   : > { %414 = sbr.rel (%p411_p2) target bundleno = 1153 (0x481), region = 72  ;;  %p465_p3 = scmp.lt.s32.totalorder (!%p411_p2), %s1153_s29, 7  ;;  %1211 = vmatprep.subr.bf16.mxu0 (!%p411_p2), %v1279_v0  ;;  %v1283_v4 = vld [vmem:[%s1504_s6] sm:$0xff] (!%p411_p2)   ;;  %v1284_v5 = vld [vmem:[%s1504_s6 + $0x8] sm:$0xff] (!%p411_p2)   ;;  %1273 = vset.pattern.permute.xlu1 (!%p411_p2), %v1303_v7  ;;  %v1305_v13 = vmov (!%p411_p2), 2  }
   0x7   : > { %1212 = vmatpush3.bf16.msra.mxu0 (!%p411_p2), %v1279_v0  ;;  %1219 = vmatprep.subr.bf16.mxu1 (!%p411_p2), %v1283_v4  ;;  %v1285_v6 = vld [vmem:[%s1505_s7] sm:$0xff] (!%p411_p2)   ;;  %v1286_v30 = vld [vmem:[%s1505_s7 + $0x8] sm:$0xff] (!%p411_p2)   ;;  %v620_v41 = vshrl.u32 (!%p411_p2), %v619_v38, 7  ;;  %s1307_s23 = smov (!%p411_p2), 96  }
   0x8   : > { %1213 = vmatprep.subr.bf16.mxu0 (!%p411_p2), %v1280_v1  ;;  %1220 = vmatpush3.bf16.msra.mxu1 (!%p411_p2), %v1283_v4  ;;  %v1167_v14 = vld [vmem:[%s1502_s4] ss:$0 sm:$0xff] (!%p411_p2)  ;;  %v1290_v33 = vld [vmem:[%s1507_s9 + $0x8] sm:$0xff] (!%p411_p2)  }
   0x9   : > { %1221 = vmatprep.subr.bf16.mxu1 (!%p411_p2), %v1284_v5  ;;  %1272 = vset.pattern.permute.xlu0 (!%p411_p2), %v1304_v8  ;;  %v1289_v32 = vld [vmem:[%s1507_s9] sm:$0xff] (!%p411_p2)   ;;  %v645_v44 = vsub.s32 (!%p411_p2), 1, %v620_v41  ;;  %v621_v45 = vsub.s32 (!%p411_p2), 0, %v620_v41  ;;  %v673_v49 = vsub.s32 (!%p411_p2), 2, %v620_v41  ;;  %v1292_v41 = vld [vmem:[%s1509_s11 + $0x8] sm:$0xff] (!%p411_p2)  }
   0xa   : > { %v598_v46 = vld [vmem:[%s1503_s5] sm:$0x7] (!%p411_p2) }
   0xb   : > { %1214 = vmatpush3.bf16.msra.mxu0 (!%p411_p2), %v1280_v1  ;;  %v646_v47 = vrot.slane (!%p411_p2), %v598_v46, %v645_v44  ;;  %v622_v48 = vrot.slane (!%p411_p2), %v598_v46, %v621_v45  ;;  %v674_v56 = vrot.slane (!%p411_p2), %v598_v46, %v673_v49 }
   0xc   : > { %1222 = vmatpush3.bf16.msra.mxu1 (!%p411_p2), %v1284_v5  ;;  %1235 = vmatprep.subr.bf16.mxu0 (!%p411_p2), %v1289_v32 }
   0xd   : > { %s1513_s29 = smov (!%p465_p3, %s1153_s29), 7  ;;  %1227 = vmatprep.subr.bf16.mxu1 %v1285_v6 }
   0xe   : > { %s1154_s15 = sshll.u32 %s1513_s29, 2  ;;  %s1158_s30 = sshll.u32 %s1513_s29, 3 }
   0xf   : > { %s468_s18 = scalar_lea.vmem %s1498_s0, %s1154_s15  ;;  %s1401_s21 = scalar_lea.vmem %s1499_s1, %s1154_s15 }
  0x10   : > { %v1403_v2 = vld [vmem:[%s468_s18] sm:$0xff]   ;;  %v1405_v3 = vld [vmem:[%s468_s18 + $0x8] sm:$0xff]   ;;  %s480_s16 = scalar_lea.vmem %s1500_s2, %s1158_s30  ;;  %s1306_s15 = smov 32  }
  0x11   : > { %1215 = vmatprep.mubr.msk.bf16.mxu0 %vm527_vm0, %v1403_v2  ;;  %v497_v9 = vld [vmem:[%s480_s16] sm:$0xff]  ;;  %v498_v10 = vld [vmem:[%s480_s16 + $0x8] sm:$0xff]  ;;  %v499_v11 = vld [vmem:[%s480_s16 + $0x10] sm:$0xff]  ;;  %s486_s28 = scalar_lea.vmem %s1511_s13, %s1158_s30 }
  0x12   : > { %1216 = vmatmul.mubr.msk.bf16.vlgmr.msra.gmra.mrb[0].mxu0 %vm527_vm0, %v1405_v3  ;;  %628 = vperm.xlu1 %1273, %v497_v9   ;;  %v500_v12 = vld [vmem:[%s480_s16 + $0x18] sm:$0xff]  ;;  %v1287_v29 = vld [vmem:[%s1401_s21] sm:$0xff]   ;;  %v1288_v31 = vld [vmem:[%s1401_s21 + $0x8] sm:$0xff]  }
  0x13   : > { %601 = vperm.xlu0 %1272, %v497_v9   ;;  %1236 = vmatpush3.bf16.msra.mxu0 %v1289_v32 }
  0x14   : > { %1237 = vmatprep.subr.bf16.mxu0 %v1290_v33 }
  0x16   : > { %632 = vperm.xlu1 %1273, %v498_v10  }
  0x17   : > { %606 = vperm.xlu0 %1272, %v498_v10   ;;  %1238 = vmatpush3.bf16.msra.mxu0 %v1290_v33 }
  0x1a   : > { %1274 = vset.pattern.permute.xlu1 %v1304_v8 }
  0x1b   : > { %611 = vperm.xlu0 %1272, %v499_v11   ;;  %616 = vperm.xlu1 %1274, %v500_v12  }
  0x1f   : > { %1275 = vset.pattern.permute.xlu0 %v1303_v7  ;;  %1276 = vset.pattern.permute.xlu1 %v1303_v7 }
  0x20   : > { %636 = vperm.xlu0 %1275, %v499_v11   ;;  %640 = vperm.xlu1 %1276, %v500_v12  }
  0x24   : > { %1278 = vset.pattern.permute.xlu0 %v1305_v13  ;;  %1277 = vset.pattern.permute.xlu1 %v1305_v13 }
  0x25   : > { %660 = vperm.xlu0 %1278, %v498_v10   ;;  %656 = vperm.xlu1 %1277, %v497_v9  }
  0x29   : > { %664 = vperm.xlu1 %1277, %v499_v11   ;;  %v1178_v11 = vld [vmem:[%s1506_s8] ss:$0 sm:$0xff] }
  0x2d   : > { %668 = vperm.xlu1 %1277, %v500_v12  }
  0x91   : > { %v629_v34 = vpop.permute.xlu1 %628 }
  0x92   : > { %v602_v37 = vpop.permute.xlu0 %601  ;;  %v647_v54 = vmul.f32 %v646_v47, %v629_v34 }
  0x93   : > { %v623_v55 = vmul.f32 %v622_v48, %v602_v37 }
  0x95   : > { %v633_v35 = vpop.permute.xlu1 %632  ;;  %v651_v1 = vadd.f32 %v647_v54, %v623_v55 }
  0x96   : > { %v607_v40 = vpop.permute.xlu0 %606  ;;  %v648_v59 = vmul.f32 %v646_v47, %v633_v35 }
  0x97   : > { %v624_v60 = vmul.f32 %v622_v48, %v607_v40  ;;  %v1291_v40 = vld [vmem:[%s1509_s11] sm:$0xff]  }
  0x98   : > { %1243 = vmatprep.subr.bf16.mxu0 %v1291_v40 }
  0x99   : > { %v652_v7 = vadd.f32 %v648_v59, %v624_v60 }
  0x9a   : > { %v617_v36 = vpop.permute.xlu1 %616  ;;  %v612_v43 = vpop.permute.xlu0 %611 }
  0x9b   : > { %v625_v52 = vmul.f32 %v622_v48, %v612_v43  ;;  %v626_v57 = vmul.f32 %v622_v48, %v617_v36 }
  0x9f   : > { %v641_v39 = vpop.permute.xlu1 %640  ;;  %v637_v51 = vpop.permute.xlu0 %636 }
  0xa0   : > { %v649_v53 = vmul.f32 %v646_v47, %v637_v51  ;;  %v650_v58 = vmul.f32 %v646_v47, %v641_v39 }
  0xa2   : > { %v653_v62 = vadd.f32 %v649_v53, %v625_v52  ;;  %v654_v5 = vadd.f32 %v650_v58, %v626_v57 }
  0xa4   : > { %v657_v42 = vpop.permute.xlu1 %656  ;;  %v661_v63 = vpop.permute.xlu0 %660 }
  0xa5   : > { %v675_v4 = vmul.f32 %v674_v56, %v657_v42  ;;  %v676_v8 = vmul.f32 %v674_v56, %v661_v63  ;;  %v1183_v42 = vld [vmem:[%s1508_s10] ss:$0 sm:$0xff] }
  0xa7   : > { %v679_v12 = vadd.f32 %v675_v4, %v651_v1 }
  0xa8   : > { %v665_v50 = vpop.permute.xlu1 %664 }
  0xa9   : > { %v677_v0 = vmul.f32 %v674_v56, %v665_v50 }
  0xab   : > { %v681_v9 = vadd.f32 %v677_v0, %v653_v62  ;;  %v1057_v0 = vunpack.c.h.bf16 %v1403_v2 }
  0xac   : > { %v669_v61 = vpop.permute.xlu1 %668 }
  0xe5   : > { %v1429_v15 = vpop.f32.mrb[0].mxu0 }
  0xe6   : > { %v592_v16 = vadd.f32 %v1429_v15, %v1167_v14  ;;  %v1432_v17 = vpop.f32.mrb[1].mxu0 }
  0xe7   : > { %v590_v18 = vadd.f32 %v1167_v14, %v1432_v17  ;;  %v1435_v19 = vpop.f32.mrb[2].mxu0 }
  0xe8   : > { %v593_v20 = vadd.f32 %v1435_v19, %v1167_v14  ;;  %v1438_v21 = vpop.f32.mrb[3].mxu0  ;;  %v596_v23 = vmax.f32 %v592_v16, 0.0 }
  0xe9   : > { %v591_v22 = vadd.f32 %v1167_v14, %v1438_v21  ;;  %v594_v25 = vmax.f32 %v590_v18, 0.0 }
  0xea   : > { %v597_v24 = vmax.f32 %v593_v20, 0.0 }
  0xeb   : > { %v595_v26 = vmax.f32 %v591_v22, 0.0  ;;  %v680_v22 = vadd.f32 %v676_v8, %v652_v7 }
  0xec   : > { %v684_v27 = vpack.c.bf16 %v597_v24, %v596_v23 }
  0xed   : > { %v683_v28 = vpack.c.bf16 %v595_v26, %v594_v25 }
  0xef   : > { %1223 = vmatprep.mubr.msk.bf16.mxu1 %vm527_vm0, %v683_v28 }
  0xf0   : > { %1224 = vmatmul.mubr.msk.bf16.vlgmr.msra.gmra.mrb[0].mxu1 %vm527_vm0, %v684_v27 }
  0xf1   : > { %1228 = vmatpush3.bf16.msra.mxu1 %v1285_v6  ;;  %1231 = vmatprep.mubr.msk.bf16.mxu1 %vm527_vm0, %v1287_v29  ;;  %v678_v6 = vmul.f32 %v674_v56, %v669_v61 }
  0xf2   : > { %1229 = vmatprep.subr.bf16.mxu1 %v1286_v30 }
  0xf3   : > { %v682_v16 = vadd.f32 %v678_v6, %v654_v5  ;;  %v1058_v6 = vunpack.c.l.bf16 %v1405_v3 }
  0xf5   : > { %1230 = vmatpush3.bf16.msra.mxu1 %v1286_v30 }
  0xfc   : > { %1232 = vmatmul.mubr.msk.bf16.vlgmr.msra.gmra.mrb[0].mxu1 %vm527_vm0, %v1288_v31 }
 0x1cf   : > { %v1233_v10 = vpop.f32.mrb[0].mxu1 }
 0x1d0   : > { %v1251_v13 = vadd.f32 %v1233_v10, %v681_v9  ;;  %v826_v14 = vpop.f32.mrb[1].mxu1  ;;  %v1059_v10 = vunpack.c.h.bf16 %v1405_v3 }
 0x1d1   : > { %v1252_v18 = vadd.f32 %v826_v14, %v679_v12  ;;  %v1234_v20 = vpop.f32.mrb[2].mxu1 }
 0x1d2   : > { %v854_v23 = vadd.f32 %v1251_v13, %v1178_v11  ;;  %v1253_v24 = vadd.f32 %v1234_v20, %v682_v16  ;;  %v829_v25 = vpop.f32.mrb[3].mxu1 }
 0x1d3   : > { %v852_v26 = vadd.f32 %v1252_v18, %v1178_v11  ;;  %v1254_v27 = vadd.f32 %v829_v25, %v680_v22 }
 0x1d4   : > { %v855_v28 = vadd.f32 %v1253_v24, %v1178_v11  ;;  %v858_v30 = vmax.f32 %v854_v23, 0.0 }
 0x1d5   : > { %v853_v29 = vadd.f32 %v1254_v27, %v1178_v11  ;;  %v856_v32 = vmax.f32 %v852_v26, 0.0 }
 0x1d6   : > { %v859_v31 = vmax.f32 %v855_v28, 0.0 }
 0x1d7   : > { %v857_v33 = vmax.f32 %v853_v29, 0.0 }
 0x1d8   : > { %v861_v34 = vpack.c.bf16 %v859_v31, %v858_v30 }
 0x1d9   : > { %v860_v35 = vpack.c.bf16 %v857_v33, %v856_v32 }
 0x1db   : > { %1239 = vmatprep.mubr.msk.bf16.mxu0 %vm527_vm0, %v860_v35 }
 0x1dc   : > { %1240 = vmatmul.mubr.msk.bf16.vlgmr.msra.gmra.mrb[4].mxu0 %vm527_vm0, %v861_v34 }
 0x1dd   : > { %1244 = vmatpush3.bf16.msra.mxu0 %v1291_v40 }
 0x1de   : > { %1245 = vmatprep.subr.bf16.mxu0 %v1292_v41 }
 0x1e1   : > { %1246 = vmatpush3.bf16.msra.mxu0 %v1292_v41 }
 0x2af   : > { %v1241_v36 = vpop.f32.mrb[4].mxu0 }
 0x2b0   : > { %941 = vrot.lane.b32.xlu0 %v1241_v36, %s1306_s15  ;;  %v918_v37 = vpop.f32.mrb[5].mxu0 }
 0x2b1   : > { %v1242_v38 = vpop.f32.mrb[6].mxu0 }
 0x2b2   : > { %v921_v39 = vpop.f32.mrb[7].mxu0 }
 0x2b3   : > { %939 = vrot.lane.b32.xlu1 %v921_v39, %s1306_s15 }
 0x2b4   : > { %937 = vrot.lane.b32.xlu0 %v918_v37, %s1306_s15 }
 0x2b7   : > { %943 = vrot.lane.b32.xlu1 %v1242_v38, %s1306_s15 }
 0x2b8   : > { %959 = vrot.lane.b32.xlu0 %v1183_v42, %s1306_s15 }
 0x322   : > { %v942_v43 = vpop.permute.xlu0 %941 }
 0x323   : > { %v951_v46 = vadd.f32 %v1429_v15, %v942_v43 }
 0x325   : > { %v940_v44 = vpop.permute.xlu1 %939 }
 0x326   : > { %v938_v45 = vpop.permute.xlu0 %937  ;;  %v950_v47 = vadd.f32 %v940_v44, %v1438_v21  ;;  %v1056_v21 = vunpack.c.l.bf16 %v1403_v2 }
 0x327   : > { %v949_v48 = vadd.f32 %v938_v45, %v1432_v17 }
 0x329   : > { %v944_v49 = vpop.permute.xlu1 %943 }
 0x32a   : > { %v952_v50 = vadd.f32 %v1435_v19, %v944_v49  ;;  %v960_v51 = vpop.permute.xlu0 %959  ;;  %v1184_v19 = vld [vmem:[%s1510_s12] ss:$0 sm:$0xff] }
 0x32b   : > { %v962_v52 = vadd.f32 %v960_v51, %v949_v48  ;;  %v963_v53 = vadd.f32 %v960_v51, %v950_v47  ;;  %v964_v54 = vadd.f32 %v960_v51, %v951_v46 }
 0x32c   : > { %v965_v55 = vadd.f32 %v960_v51, %v952_v50 }
 0x32d   : > { %v966_v56 = vmax.f32 %v962_v52, 0.0  ;;  %v967_v57 = vmax.f32 %v963_v53, 0.0  ;;  %v968_v58 = vmax.f32 %v964_v54, 0.0 }
 0x32e   : > { %v969_v59 = vmax.f32 %v965_v55, 0.0 }
 0x32f   : > { %v970_v60 = vpack.c.bf16 %v967_v57, %v966_v56 }
 0x330   : > { %v971_v61 = vpack.c.bf16 %v969_v59, %v968_v58 }
 0x331   : > { %985 = vrot.lane.b32.xlu1 %v970_v60, %s1307_s23 }
 0x332   : > { %987 = vrot.lane.b32.xlu0 %v971_v61, %s1307_s23 }
 0x3a3   : > { %v986_v15 = vpop.permute.xlu1 %985 }
 0x3a4   : > { %v988_v17 = vpop.permute.xlu0 %987  ;;  %1247 = vmatprep.mubr.msk.bf16.mxu0 %vm527_vm0, %v986_v15 }
 0x3a5   : > { %1248 = vmatmul.mubr.msk.bf16.vlgmr.msra.gmra.mrb[8].mxu0 %vm527_vm0, %v988_v17 }
 0x478   : > { %v1249_v62 = vpop.f32.mrb[8].mxu0 }
 0x479   : > { %v1041_v63 = vpop.f32.mrb[9].mxu0  ;;  %v1050_v5 = vadd.f32 %v1249_v62, %v1184_v19 }
 0x47a   : > { %v1042_v1 = vadd.f32 %v1184_v19, %v1041_v63  ;;  %v1250_v4 = vpop.f32.mrb[10].mxu0 }
 0x47b   : > { %v1044_v7 = vpop.f32.mrb[11].mxu0  ;;  %v1053_v9 = vadd.f32 %v1250_v4, %v1184_v19  ;;  %v1062_v2 = vadd.f32 %v1058_v6, %v1050_v5 }
 0x47c   : > { %v1060_v8 = vadd.f32 %v1056_v21, %v1042_v1  ;;  %v1045_v11 = vadd.f32 %v1184_v19, %v1044_v7 }
 0x47d   : > { %v1063_v13 = vadd.f32 %v1059_v10, %v1053_v9  ;;  %1066 = vst.msk [vmem:[%s486_s28 + $0x10] sm:$0xff] %vm527_vm0, %v1062_v2 }
 0x47e   : > { %1064 = vst.msk [vmem:[%s486_s28] sm:$0xff] %vm527_vm0, %v1060_v8  ;;  %v1061_v12 = vadd.f32 %v1057_v0, %v1045_v11 }
 0x47f   : > { %1067 = vst.msk [vmem:[%s486_s28 + $0x18] sm:$0xff] %vm527_vm0, %v1063_v13 }
 0x480   : > { %1065 = vst.msk [vmem:[%s486_s28 + $0x8] sm:$0xff] %vm527_vm0, %v1061_v12 }
 0x481 PF: > { %s23_s25 = sadd.s32 1, %s1301_s25  }
 0x482   : > { %p20_p4 = scmp.ge.s32.totalorder %s23_s25, 4  }
 0x484   :  { %22 = sbr.rel (!%p20_p4) target bundleno = 1 (0x1), region = 108 }

</bundles_post_ra>
